<compile_context>
chip_gen: v7x
topology: tpu7x:2x2x1
jax: 0.10.0
libtpu: 0.0.40
codegen_flags: <defaults>
</compile_context>

<pallas_src>
import jax
import jax.numpy as jnp
from jax.experimental import pallas as pl
from jax.experimental.pallas import tpu as pltpu

LEAKY_SLOPE = 0.01   # torch.nn.functional.leaky_relu default
BN_EPS = 1e-5        # torch.nn.BatchNorm2d default
CNUM = 32


def calc_padding(h, w, k, s):
    h_pad = ((h - 1) * s + k - h) // 2
    w_pad = ((w - 1) * s + k - w) // 2
    return (h_pad, w_pad)


# ----------------------------------------------------------------------------
# Fused Pallas kernel: sum_t (tap_slice_t @ W_t)  -> * scale + shift -> lrelu
# ----------------------------------------------------------------------------
def _make_conv_kernel(taps, num_parts, m):
    """taps: tuple of (partition_index, static_row_offset), one per (dy, dx)."""

    def kernel(*refs):
        part_refs = refs[:num_parts]                    # (lpart, cin) bf16 each
        w_ref, scale_ref, shift_ref, o_ref = refs[num_parts:]
        acc = None
        for t, (pidx, off) in enumerate(taps):
            xs = part_refs[pidx][pl.ds(off, m), :]       # (m, cin) bf16, contiguous
            y = jnp.dot(xs, w_ref[t],                    # MXU, f32 accumulate
                        preferred_element_type=jnp.float32)
            acc = y if acc is None else acc + y
        acc = acc * scale_ref[...] + shift_ref[...]      # per-channel affine (f32)
        o_ref[...] = jnp.where(acc >= 0, acc, LEAKY_SLOPE * acc).astype(o_ref.dtype)

    return kernel


def conv2d_affine_lrelu(x, w, scale, shift, *, stride, padding):
    """Conv2d + per-channel affine (bias / folded BN) + leaky_relu, fused.

    x: (N, H, W, Cin) float32/bfloat16; w: (KH, KW, Cin, Cout).
    Returns (N, Ho, Wo, Cout) bfloat16.
    """
    n, h, wdt, cin = x.shape
    kh, kw, _, cout = w.shape
    s = stride
    ph, pw = padding

    hp0 = h + 2 * ph
    wp0 = wdt + 2 * pw
    ho = (hp0 - kh) // s + 1
    wo = (wp0 - kw) // s + 1

    # Flattened-partition geometry.
    wps = -(-wp0 // s)                                   # ceil(wp0 / s)
    m = ho * wps                                         # fused-matmul rows (incl wrap cols)
    off_max = ((kh - 1) // s) * wps + (kw - 1) // s
    hps = max(-(-hp0 // s), -(-(off_max + m) // wps))    # enough rows for every tap slice
    hp2, wp2 = hps * s, wps * s

    # Single spatial pad (+ bf16 cast); extra zero rows/cols only at bottom/right.
    xp = jnp.pad(x.astype(jnp.bfloat16),
                 ((0, 0), (ph, hp2 - h - ph), (pw, wp2 - wdt - pw), (0, 0)))

    # s*s spatial-parity partitions, each flattened to (n, hps*wps, cin).
    if s == 1:
        parts = [xp.reshape(n, hps * wps, cin)]
    else:
        parts = [xp[:, py::s, px::s, :].reshape(n, hps * wps, cin)
                 for py in range(s) for px in range(s)]
    num_parts = len(parts)
    lpart = hps * wps

    # Per-tap (partition, static offset); order matches w.reshape(kh*kw, ...).
    taps = tuple(((dy % s) * s + (dx % s), (dy // s) * wps + (dx // s))
                 for dy in range(kh) for dx in range(kw))

    w2 = w.reshape(kh * kw, cin, cout).astype(jnp.bfloat16)
    scale2 = scale.reshape(1, cout).astype(jnp.float32)
    shift2 = shift.reshape(1, cout).astype(jnp.float32)

    # VMEM budget + cost hint for XLA scheduling around the custom call.
    in_bytes = num_parts * lpart * cin * 2
    w_bytes = kh * kw * cin * cout * 2
    out_bytes = m * cout * 2
    acc_bytes = m * cout * 4
    vmem_limit = int(min(64 * 1024 * 1024,
                         max(32 * 1024 * 1024,
                             2 * (in_bytes + w_bytes + out_bytes)
                             + 3 * acc_bytes + 2 * m * cin * 2 + (2 << 20))))
    cost = pl.CostEstimate(
        flops=2 * n * m * cin * cout * kh * kw,
        transcendentals=0,
        bytes_accessed=int(n * (in_bytes + out_bytes) + w_bytes + 8 * cout))

    part_spec = pl.BlockSpec((None, lpart, cin), lambda i: (i, 0, 0))
    out = pl.pallas_call(
        _make_conv_kernel(taps, num_parts, m),
        out_shape=jax.ShapeDtypeStruct((n, m, cout), jnp.bfloat16),
        grid_spec=pltpu.PrefetchScalarGridSpec(
            num_scalar_prefetch=0,
            grid=(n,),
            in_specs=[part_spec] * num_parts + [
                pl.BlockSpec((kh * kw, cin, cout), lambda i: (0, 0, 0)),
                pl.BlockSpec((1, cout), lambda i: (0, 0)),
                pl.BlockSpec((1, cout), lambda i: (0, 0)),
            ],
            out_specs=pl.BlockSpec((None, m, cout), lambda i: (i, 0, 0)),
        ),
        compiler_params=pltpu.CompilerParams(
            dimension_semantics=("parallel",),
            vmem_limit_bytes=vmem_limit),
        cost_estimate=cost,
    )(*parts, w2, scale2, shift2)

    # Drop the wrap columns (wo..wps) and restore NHWC.
    return out.reshape(n, ho, wps, cout)[:, :, :wo, :]


# ----------------------------------------------------------------------------
# encoder_net definition (layer config is static; params are arrays only)
# ----------------------------------------------------------------------------
_SAME_PAD = (1, 1)
_STRIDE2_PAD = calc_padding(64, 128, 3, 2)   # (32, 64) — hard-coded as in model.py


def _layer_specs(in_channels):
    c = CNUM
    return (
        ("cb1",   in_channels, c,     True,  1, _SAME_PAD),
        ("cb2",   c,           c,     True,  1, _SAME_PAD),
        ("conv1", c,           2 * c, False, 2, _STRIDE2_PAD),
        ("cb3",   2 * c,       2 * c, True,  1, _SAME_PAD),
        ("cb4",   2 * c,       2 * c, True,  1, _SAME_PAD),   # -> f1
        ("conv2", 2 * c,       4 * c, False, 2, _STRIDE2_PAD),
        ("cb5",   4 * c,       4 * c, True,  1, _SAME_PAD),
        ("cb6",   4 * c,       4 * c, True,  1, _SAME_PAD),   # -> f2
        ("conv3", 4 * c,       8 * c, False, 2, _STRIDE2_PAD),
        ("cb7",   8 * c,       8 * c, True,  1, _SAME_PAD),
        ("cb8",   8 * c,       8 * c, True,  1, _SAME_PAD),
    )


def init_encoder_params(key, in_channels):
    params = []
    for i, (name, cin, cout, has_bn, _stride, _pad) in enumerate(
            _layer_specs(in_channels)):
        lk = jax.random.fold_in(key, i)
        kw_, kb_, k1, k2, k3, k4 = jax.random.split(lk, 6)
        bound = (1.0 / (cin * 3 * 3)) ** 0.5   # PyTorch Conv2d default init range
        p = {
            "w": jax.random.uniform(kw_, (3, 3, cin, cout), jnp.float32,
                                    -bound, bound),
            "b": jax.random.uniform(kb_, (cout,), jnp.float32, -bound, bound),
        }
        if has_bn:
            p["gamma"] = 1.0 + 0.1 * jax.random.normal(k1, (cout,), jnp.float32)
            p["beta"] = 0.1 * jax.random.normal(k2, (cout,), jnp.float32)
            p["mean"] = 0.1 * jax.random.normal(k3, (cout,), jnp.float32)
            p["var"] = 1.0 + 0.1 * jax.random.uniform(k4, (cout,), jnp.float32)
        params.append(p)
    return tuple(params)


def encoder_forward(params, x, in_channels, get_feature_map=False):
    """x: (N, H, W, Cin) NHWC.  Mirrors encoder_net.forward (inference)."""
    feats = {}
    out = x
    for spec, p in zip(_layer_specs(in_channels), params):
        name, _cin, _cout, has_bn, stride, pad = spec
        if has_bn:
            # Conv bias + BatchNorm (inference) folded into one affine.
            scale = p["gamma"] / jnp.sqrt(p["var"] + BN_EPS)
            shift = p["beta"] + (p["b"] - p["mean"]) * scale
        else:
            scale = jnp.ones_like(p["b"])
            shift = p["b"]
        out = conv2d_affine_lrelu(out, p["w"], scale, shift,
                                  stride=stride, padding=pad)
        if name == "cb4":
            feats["f1"] = out
        elif name == "cb6":
            feats["f2"] = out
    out = out.astype(jnp.float32)
    if get_feature_map:
        return out, [feats["f2"].astype(jnp.float32),
                     feats["f1"].astype(jnp.float32)]
    return out


# ----------------------------------------------------------------------------
if __name__ == "__main__":
    key = jax.random.PRNGKey(0)
    k_x, k_p, k_t = jax.random.split(key, 3)

    # --- small correctness smoke tests of the fused conv kernel (stride 1 & 2)
    kx1, kw1, ks1, ks2 = jax.random.split(k_t, 4)
    xt = jax.random.normal(kx1, (2, 8, 10, 4), jnp.float32)
    wt = 0.2 * jax.random.normal(kw1, (3, 3, 4, 16), jnp.float32)
    sc = 1.0 + 0.1 * jax.random.normal(ks1, (16,), jnp.float32)
    sh = 0.1 * jax.random.normal(ks2, (16,), jnp.float32)

    def _reference(xr, wr, scr, shr, stride, padding):
        # Reference conv on the same bf16-rounded operands, f32 math.
        x32 = xr.astype(jnp.bfloat16).astype(jnp.float32)
        w32 = wr.astype(jnp.bfloat16).astype(jnp.float32)
        y = jax.lax.conv_general_dilated(
            x32, w32, window_strides=(stride, stride),
            padding=((padding[0], padding[0]), (padding[1], padding[1])),
            dimension_numbers=("NHWC", "HWIO", "NHWC"))
        y = y * scr.reshape(1, 1, 1, -1) + shr.reshape(1, 1, 1, -1)
        return jnp.where(y >= 0, y, LEAKY_SLOPE * y)

    for stride, pad in ((1, (1, 1)), (2, (2, 3))):
        got = conv2d_affine_lrelu(xt, wt, sc, sh, stride=stride,
                                  padding=pad).astype(jnp.float32)
        want = _reference(xt, wt, sc, sh, stride, pad)
        assert got.shape == want.shape, (got.shape, want.shape)
        assert bool(jnp.allclose(got, want, rtol=5e-2, atol=5e-2)), (
            "fused conv mismatch at stride", stride,
            float(jnp.max(jnp.abs(got - want))))

    # --- full encoder forward -------------------------------------------------
    N, C_IN, H, W = 2, 3, 16, 16
    x_nchw = jax.random.normal(k_x, (N, C_IN, H, W), jnp.float32)  # PyTorch layout
    x_nhwc = jnp.transpose(x_nchw, (0, 2, 3, 1))                   # kernel layout

    params = init_encoder_params(k_p, C_IN)
    fwd = jax.jit(lambda p, xx: encoder_forward(p, xx, C_IN,
                                                get_feature_map=False))
    out = jax.block_until_ready(fwd(params, x_nhwc))

    # Output channels = 8 * cnum = 256 (NHWC); equivalent NCHW = transpose back.
    assert out.shape[0] == N and out.shape[-1] == 8 * CNUM, out.shape
    print("KERNEL_OK")
</pallas_src>

<mosaic_0001>
module attributes {stable_mosaic.version = 11 : i64} {
  func.func @kernel(%arg0: i32, %arg1: memref<1x132x4xbf16, #tpu.memory_space<vmem>>, %arg2: memref<9x4x16xbf16, #tpu.memory_space<vmem>>, %arg3: memref<1x16xf32, #tpu.memory_space<vmem>>, %arg4: memref<1x16xf32, #tpu.memory_space<vmem>>, %arg5: memref<1x96x16xbf16, #tpu.memory_space<vmem>>) attributes {dimension_semantics = [#tpu.dimension_semantics<parallel>], iteration_bounds = array<i64: 2>, scalar_prefetch = 0 : i64, scratch_operands = 0 : i64, tpu.core_type = #tpu.core_type<tc>, window_params = [{transform_indices = @transform_0, window_bounds = array<i64: 1, 132, 4>}, {pipeline_mode = #tpu.pipeline_mode<synchronous>, transform_indices = @transform_1, window_bounds = array<i64: 9, 4, 16>}, {pipeline_mode = #tpu.pipeline_mode<synchronous>, transform_indices = @transform_2, window_bounds = array<i64: 1, 16>}, {pipeline_mode = #tpu.pipeline_mode<synchronous>, transform_indices = @transform_3, window_bounds = array<i64: 1, 16>}, {transform_indices = @transform_4, window_bounds = array<i64: 1, 96, 16>}]} {
    %c0 = arith.constant 0 : index
    %c0_0 = arith.constant 0 : index
    %c0_1 = arith.constant 0 : index
    %0 = vector.load %arg1[%c0, %c0_0, %c0_1] : memref<1x132x4xbf16, #tpu.memory_space<vmem>>, vector<1x96x4xbf16>
    %1 = vector.shape_cast %0 : vector<1x96x4xbf16> to vector<96x4xbf16>
    %c0_2 = arith.constant 0 : index
    %c0_3 = arith.constant 0 : index
    %c0_4 = arith.constant 0 : index
    %2 = vector.load %arg2[%c0_2, %c0_3, %c0_4] : memref<9x4x16xbf16, #tpu.memory_space<vmem>>, vector<1x4x16xbf16>
    %3 = vector.shape_cast %2 : vector<1x4x16xbf16> to vector<4x16xbf16>
    %cst = arith.constant dense<0.000000e+00> : vector<96x16xf32>
    %4 = tpu.matmul %1, %3, %cst {dimension_numbers = #tpu.dot_dimension_numbers<[1], [0], [0], [1], [0, 0, 1, 1], [], []>} : vector<96x4xbf16>, vector<4x16xbf16>, vector<96x16xf32> -> vector<96x16xf32>
    %c0_5 = arith.constant 0 : index
    %c1 = arith.constant 1 : index
    %c0_6 = arith.constant 0 : index
    %5 = vector.load %arg1[%c0_5, %c1, %c0_6] : memref<1x132x4xbf16, #tpu.memory_space<vmem>>, vector<1x96x4xbf16>
    %6 = vector.shape_cast %5 : vector<1x96x4xbf16> to vector<96x4xbf16>
    %c1_7 = arith.constant 1 : index
    %c0_8 = arith.constant 0 : index
    %c0_9 = arith.constant 0 : index
    %7 = vector.load %arg2[%c1_7, %c0_8, %c0_9] : memref<9x4x16xbf16, #tpu.memory_space<vmem>>, vector<1x4x16xbf16>
    %8 = vector.shape_cast %7 : vector<1x4x16xbf16> to vector<4x16xbf16>
    %cst_10 = arith.constant dense<0.000000e+00> : vector<96x16xf32>
    %9 = tpu.matmul %6, %8, %cst_10 {dimension_numbers = #tpu.dot_dimension_numbers<[1], [0], [0], [1], [0, 0, 1, 1], [], []>} : vector<96x4xbf16>, vector<4x16xbf16>, vector<96x16xf32> -> vector<96x16xf32>
    %10 = arith.addf %4, %9 : vector<96x16xf32>
    %c0_11 = arith.constant 0 : index
    %c2 = arith.constant 2 : index
    %c0_12 = arith.constant 0 : index
    %11 = vector.load %arg1[%c0_11, %c2, %c0_12] : memref<1x132x4xbf16, #tpu.memory_space<vmem>>, vector<1x96x4xbf16>
    %12 = vector.shape_cast %11 : vector<1x96x4xbf16> to vector<96x4xbf16>
    %c2_13 = arith.constant 2 : index
    %c0_14 = arith.constant 0 : index
    %c0_15 = arith.constant 0 : index
    %13 = vector.load %arg2[%c2_13, %c0_14, %c0_15] : memref<9x4x16xbf16, #tpu.memory_space<vmem>>, vector<1x4x16xbf16>
    %14 = vector.shape_cast %13 : vector<1x4x16xbf16> to vector<4x16xbf16>
    %cst_16 = arith.constant dense<0.000000e+00> : vector<96x16xf32>
    %15 = tpu.matmul %12, %14, %cst_16 {dimension_numbers = #tpu.dot_dimension_numbers<[1], [0], [0], [1], [0, 0, 1, 1], [], []>} : vector<96x4xbf16>, vector<4x16xbf16>, vector<96x16xf32> -> vector<96x16xf32>
    %16 = arith.addf %10, %15 : vector<96x16xf32>
    %c0_17 = arith.constant 0 : index
    %c12 = arith.constant 12 : index
    %c0_18 = arith.constant 0 : index
    %17 = vector.load %arg1[%c0_17, %c12, %c0_18] : memref<1x132x4xbf16, #tpu.memory_space<vmem>>, vector<1x96x4xbf16>
    %18 = vector.shape_cast %17 : vector<1x96x4xbf16> to vector<96x4xbf16>
    %c3 = arith.constant 3 : index
    %c0_19 = arith.constant 0 : index
    %c0_20 = arith.constant 0 : index
    %19 = vector.load %arg2[%c3, %c0_19, %c0_20] : memref<9x4x16xbf16, #tpu.memory_space<vmem>>, vector<1x4x16xbf16>
    %20 = vector.shape_cast %19 : vector<1x4x16xbf16> to vector<4x16xbf16>
    %cst_21 = arith.constant dense<0.000000e+00> : vector<96x16xf32>
    %21 = tpu.matmul %18, %20, %cst_21 {dimension_numbers = #tpu.dot_dimension_numbers<[1], [0], [0], [1], [0, 0, 1, 1], [], []>} : vector<96x4xbf16>, vector<4x16xbf16>, vector<96x16xf32> -> vector<96x16xf32>
    %22 = arith.addf %16, %21 : vector<96x16xf32>
    %c0_22 = arith.constant 0 : index
    %c13 = arith.constant 13 : index
    %c0_23 = arith.constant 0 : index
    %23 = vector.load %arg1[%c0_22, %c13, %c0_23] : memref<1x132x4xbf16, #tpu.memory_space<vmem>>, vector<1x96x4xbf16>
    %24 = vector.shape_cast %23 : vector<1x96x4xbf16> to vector<96x4xbf16>
    %c4 = arith.constant 4 : index
    %c0_24 = arith.constant 0 : index
    %c0_25 = arith.constant 0 : index
    %25 = vector.load %arg2[%c4, %c0_24, %c0_25] : memref<9x4x16xbf16, #tpu.memory_space<vmem>>, vector<1x4x16xbf16>
    %26 = vector.shape_cast %25 : vector<1x4x16xbf16> to vector<4x16xbf16>
    %cst_26 = arith.constant dense<0.000000e+00> : vector<96x16xf32>
    %27 = tpu.matmul %24, %26, %cst_26 {dimension_numbers = #tpu.dot_dimension_numbers<[1], [0], [0], [1], [0, 0, 1, 1], [], []>} : vector<96x4xbf16>, vector<4x16xbf16>, vector<96x16xf32> -> vector<96x16xf32>
    %28 = arith.addf %22, %27 : vector<96x16xf32>
    %c0_27 = arith.constant 0 : index
    %c14 = arith.constant 14 : index
    %c0_28 = arith.constant 0 : index
    %29 = vector.load %arg1[%c0_27, %c14, %c0_28] : memref<1x132x4xbf16, #tpu.memory_space<vmem>>, vector<1x96x4xbf16>
    %30 = vector.shape_cast %29 : vector<1x96x4xbf16> to vector<96x4xbf16>
    %c5 = arith.constant 5 : index
    %c0_29 = arith.constant 0 : index
    %c0_30 = arith.constant 0 : index
    %31 = vector.load %arg2[%c5, %c0_29, %c0_30] : memref<9x4x16xbf16, #tpu.memory_space<vmem>>, vector<1x4x16xbf16>
    %32 = vector.shape_cast %31 : vector<1x4x16xbf16> to vector<4x16xbf16>
    %cst_31 = arith.constant dense<0.000000e+00> : vector<96x16xf32>
    %33 = tpu.matmul %30, %32, %cst_31 {dimension_numbers = #tpu.dot_dimension_numbers<[1], [0], [0], [1], [0, 0, 1, 1], [], []>} : vector<96x4xbf16>, vector<4x16xbf16>, vector<96x16xf32> -> vector<96x16xf32>
    %34 = arith.addf %28, %33 : vector<96x16xf32>
    %c0_32 = arith.constant 0 : index
    %c24 = arith.constant 24 : index
    %c0_33 = arith.constant 0 : index
    %35 = vector.load %arg1[%c0_32, %c24, %c0_33] : memref<1x132x4xbf16, #tpu.memory_space<vmem>>, vector<1x96x4xbf16>
    %36 = vector.shape_cast %35 : vector<1x96x4xbf16> to vector<96x4xbf16>
    %c6 = arith.constant 6 : index
    %c0_34 = arith.constant 0 : index
    %c0_35 = arith.constant 0 : index
    %37 = vector.load %arg2[%c6, %c0_34, %c0_35] : memref<9x4x16xbf16, #tpu.memory_space<vmem>>, vector<1x4x16xbf16>
    %38 = vector.shape_cast %37 : vector<1x4x16xbf16> to vector<4x16xbf16>
    %cst_36 = arith.constant dense<0.000000e+00> : vector<96x16xf32>
    %39 = tpu.matmul %36, %38, %cst_36 {dimension_numbers = #tpu.dot_dimension_numbers<[1], [0], [0], [1], [0, 0, 1, 1], [], []>} : vector<96x4xbf16>, vector<4x16xbf16>, vector<96x16xf32> -> vector<96x16xf32>
    %40 = arith.addf %34, %39 : vector<96x16xf32>
    %c0_37 = arith.constant 0 : index
    %c25 = arith.constant 25 : index
    %c0_38 = arith.constant 0 : index
    %41 = vector.load %arg1[%c0_37, %c25, %c0_38] : memref<1x132x4xbf16, #tpu.memory_space<vmem>>, vector<1x96x4xbf16>
    %42 = vector.shape_cast %41 : vector<1x96x4xbf16> to vector<96x4xbf16>
    %c7 = arith.constant 7 : index
    %c0_39 = arith.constant 0 : index
    %c0_40 = arith.constant 0 : index
    %43 = vector.load %arg2[%c7, %c0_39, %c0_40] : memref<9x4x16xbf16, #tpu.memory_space<vmem>>, vector<1x4x16xbf16>
    %44 = vector.shape_cast %43 : vector<1x4x16xbf16> to vector<4x16xbf16>
    %cst_41 = arith.constant dense<0.000000e+00> : vector<96x16xf32>
    %45 = tpu.matmul %42, %44, %cst_41 {dimension_numbers = #tpu.dot_dimension_numbers<[1], [0], [0], [1], [0, 0, 1, 1], [], []>} : vector<96x4xbf16>, vector<4x16xbf16>, vector<96x16xf32> -> vector<96x16xf32>
    %46 = arith.addf %40, %45 : vector<96x16xf32>
    %c0_42 = arith.constant 0 : index
    %c26 = arith.constant 26 : index
    %c0_43 = arith.constant 0 : index
    %47 = vector.load %arg1[%c0_42, %c26, %c0_43] : memref<1x132x4xbf16, #tpu.memory_space<vmem>>, vector<1x96x4xbf16>
    %48 = vector.shape_cast %47 : vector<1x96x4xbf16> to vector<96x4xbf16>
    %c8 = arith.constant 8 : index
    %c0_44 = arith.constant 0 : index
    %c0_45 = arith.constant 0 : index
    %49 = vector.load %arg2[%c8, %c0_44, %c0_45] : memref<9x4x16xbf16, #tpu.memory_space<vmem>>, vector<1x4x16xbf16>
    %50 = vector.shape_cast %49 : vector<1x4x16xbf16> to vector<4x16xbf16>
    %cst_46 = arith.constant dense<0.000000e+00> : vector<96x16xf32>
    %51 = tpu.matmul %48, %50, %cst_46 {dimension_numbers = #tpu.dot_dimension_numbers<[1], [0], [0], [1], [0, 0, 1, 1], [], []>} : vector<96x4xbf16>, vector<4x16xbf16>, vector<96x16xf32> -> vector<96x16xf32>
    %52 = arith.addf %46, %51 : vector<96x16xf32>
    %c0_47 = arith.constant 0 : index
    %c0_48 = arith.constant 0 : index
    %53 = vector.load %arg3[%c0_47, %c0_48] : memref<1x16xf32, #tpu.memory_space<vmem>>, vector<1x16xf32>
    %54 = vector.broadcast %53 : vector<1x16xf32> to vector<96x16xf32>
    %55 = arith.mulf %52, %54 : vector<96x16xf32>
    %c0_49 = arith.constant 0 : index
    %c0_50 = arith.constant 0 : index
    %56 = vector.load %arg4[%c0_49, %c0_50] : memref<1x16xf32, #tpu.memory_space<vmem>>, vector<1x16xf32>
    %57 = vector.broadcast %56 : vector<1x16xf32> to vector<96x16xf32>
    %58 = arith.addf %55, %57 : vector<96x16xf32>
    %cst_51 = arith.constant 0.000000e+00 : f32
    %59 = vector.broadcast %cst_51 : f32 to vector<96x16xf32>
    %60 = arith.cmpf oge, %58, %59 : vector<96x16xf32>
    %cst_52 = arith.constant 0.00999999977 : f32
    %61 = vector.broadcast %cst_52 : f32 to vector<96x16xf32>
    %62 = arith.mulf %61, %58 : vector<96x16xf32>
    %63 = arith.select %60, %58, %62 : vector<96x16xi1>, vector<96x16xf32>
    %64 = arith.truncf %63 : vector<96x16xf32> to vector<96x16xbf16>
    %c0_53 = arith.constant 0 : index
    %c0_54 = arith.constant 0 : index
    %c0_55 = arith.constant 0 : index
    %65 = vector.load %arg5[%c0_53, %c0_54, %c0_55] : memref<1x96x16xbf16, #tpu.memory_space<vmem>>, vector<1x96x16xbf16>
    %66 = vector.shape_cast %65 : vector<1x96x16xbf16> to vector<96x16xbf16>
    %67 = vector.shape_cast %64 : vector<96x16xbf16> to vector<1x96x16xbf16>
    tpu.vector_store %arg5[%c0_53, %c0_54, %c0_55], %67 {strides = array<i32>} : memref<1x96x16xbf16, #tpu.memory_space<vmem>>, vector<1x96x16xbf16>,
    return
  }
  func.func @transform_0(%arg0: i32) -> (i32, i32, i32) {
    %c0_i32 = arith.constant 0 : i32
    %c0_i32_0 = arith.constant 0 : i32
    %c0_i32_1 = arith.constant 0 : i32
    return %arg0, %c0_i32, %c0_i32_0 : i32, i32, i32
  }
  func.func @transform_1(%arg0: i32) -> (i32, i32, i32) {
    %c0_i32 = arith.constant 0 : i32
    %c0_i32_0 = arith.constant 0 : i32
    %c0_i32_1 = arith.constant 0 : i32
    %c0_i32_2 = arith.constant 0 : i32
    return %c0_i32, %c0_i32_0, %c0_i32_1 : i32, i32, i32
  }
  func.func @transform_2(%arg0: i32) -> (i32, i32) {
    %c0_i32 = arith.constant 0 : i32
    %c0_i32_0 = arith.constant 0 : i32
    %c0_i32_1 = arith.constant 0 : i32
    return %c0_i32, %c0_i32_0 : i32, i32
  }
  func.func @transform_3(%arg0: i32) -> (i32, i32) {
    %c0_i32 = arith.constant 0 : i32
    %c0_i32_0 = arith.constant 0 : i32
    %c0_i32_1 = arith.constant 0 : i32
    return %c0_i32, %c0_i32_0 : i32, i32
  }
  func.func @transform_4(%arg0: i32) -> (i32, i32, i32) {
    %c0_i32 = arith.constant 0 : i32
    %c0_i32_0 = arith.constant 0 : i32
    %c0_i32_1 = arith.constant 0 : i32
    return %arg0, %c0_i32, %c0_i32_0 : i32, i32, i32
  }
}

</mosaic_0001>

<bundles_post_ra>
// kernel: tpu_custom_call.1
= control target key start
LH: loop header
LB: loop body
LE: loop exit
PB: predicated region body
PF: predicated region fallthrough
CT: control target
= control target key end

     0   :  { %s2322_s15 = smov 0   ;;  %s2770_s0 = inlined_call_operand.vmem [shape: bf16[2,132,4], index: 0, kind: input, shape index: {}]   ;;  %s2771_s1 = inlined_call_operand.vmem [shape: bf16[9,4,16], index: 1, kind: input, shape index: {}]   ;;  %s2772_s2 = inlined_call_operand.vmem [shape: f32[1,16], index: 2, kind: input, shape index: {}]   ;;  %s2773_s3 = inlined_call_operand.vmem [shape: f32[1,16], index: 3, kind: input, shape index: {}]   ;;  %s2774_s4 = inlined_call_operand.vmem [shape: bf16[2,96,16], index: 4, kind: output, shape index: {}]  }
   0x1 LB: > { %s1823_s16 = sadd.s32 4294967295, %s2295_s15   ;;  %p1827_p0 = scmp.ge.s32.totalorder %s2295_s15, 1  ;;  %s2295_s15 = sphi %s2322_s15, %s14_s15  }
   0x2   : > { %p162_p1 = scmp.lt.s32.totalorder %s2295_s15, 3 }
   0x4   : > { %p163_p2 = pnand %p1827_p0, %p162_p1 }
   0x5   : > { %v1830_v0 = vld [vmem:[%s2771_s1 + $0x2] sm:$0x3] (!%p163_p2)  ;;  %vm320_vm0 = vcmask (!%p163_p2), 1041408   ;;  %v2336_v1 = vld [vmem:[%s2771_s1 + $0x8] sm:$0x3] (!%p163_p2)  ;;  %p188_p3 = scmp.lt.s32.totalorder (!%p163_p2), %s1823_s16, 1 }
   0x6   : > { %166 = sbr.rel (%p163_p2) target bundleno = 360 (0x168), region = 36  ;;  %2238 = vmatprep.subr.msk.bf16.mxu1 (!%p163_p2), %vm320_vm0, %v1830_v0  ;;  %v322_v2 = vsel (!%p163_p2), %vm320_vm0, %v1830_v0, 0  ;;  %2242 = vmatprep.subr.msk.bf16.mxu0 (!%p163_p2), %vm320_vm0, %v2336_v1  ;;  %v2344_v3 = vsel (!%p163_p2), %vm320_vm0, %v2336_v1, 0  ;;  %v211_v4 = vld [vmem:[%s2771_s1] sm:$0x3] (!%p163_p2)  ;;  %vm301_vm2 = vcmask (!%p163_p2), 31744  }
   0x7   : > { %2015 = vmatpush3.bf16.msra.mxu1 (!%p163_p2), %v322_v2  ;;  %2071 = vmatpush3.bf16.msra.mxu0 (!%p163_p2), %v2344_v3  ;;  %v2356_v5 = vld [vmem:[%s2771_s1 + $0xa] sm:$0x3] (!%p163_p2)  ;;  %vm248_vm1 = vsmask.f32 (!%p163_p2), 7424  ;;  %vm817_vm3 = vsmask.f32 (!%p163_p2), 5376 }
   0x8   : > { %2239 = vmatprep.subr.msk.bf16.mxu1 (!%p163_p2), %vm320_vm0, %v211_v4  ;;  %2244 = vmatprep.subr.msk.bf16.mxu0 (!%p163_p2), %vm320_vm0, %v2356_v5  ;;  %v418_v11 = vsel (!%p163_p2), %vm320_vm0, %v211_v4, 0  ;;  %vm1000_vm4 = vcmask (!%p163_p2), 1044480   ;;  %v2409_v38 = vld [vmem:[%s2771_s1 + $0x4] sm:$0x3] (!%p163_p2)  ;;  %v1033_v59 = vsel (!%p163_p2), %vm320_vm0, %v2356_v5, 0  ;;  %vm683_vm5 = vcmask (!%p163_p2), 1045504  }
   0x9   : > { %v1888_v62 = vld [vmem:[%s2771_s1 + $0xc] sm:$0x3] (!%p163_p2)  ;;  %vm507_vm6 = vcmask (!%p163_p2), 1046528   ;;  %vm1755_vm8 = vcmask (!%p163_p2), 125952  }
   0xd   : > { %s2776_s16 = smov (!%p188_p3, %s1823_s16), 1 }
   0xe   : > { %s2248_s25 = smul.u32 68, %s2776_s16 }
   0xf   : > { %s2249_s19 = smul.u32 48, %s2776_s16 }
  0x10   : > { %s2364_s28 = scalar_lea.vmem %s2770_s0, %s2248_s25 }
  0x11   : > { %v199_v6 = vld [vmem:[%s2364_s28] sm:$0xf]  ;;  %v2368_v7 = vld [vmem:[%s2364_s28 + $0x4] sm:$0xf]  ;;  %v2374_v9 = vld [vmem:[%s2364_s28 + $0x8] sm:$0xff]   ;;  %s2725_s21 = scalar_lea.vmem %s2774_s4, %s2249_s19 }
  0x12   : > { %v2371_v8 = vcombine.low %v199_v6, %v2368_v7  ;;  %v635_v10 = vld [vmem:[%s2364_s28 + $0x4] sm:$0xc]  ;;  %v636_v12 = vld [vmem:[%s2364_s28 + $0x8] sm:$0xf]  ;;  %v257_v15 = vshll.u32 %v2374_v9, 16  ;;  %v261_v16 = vshrl.u32 %v2374_v9, 16 }
  0x13   : > { %v2384_v17 = vld [vmem:[%s2364_s28 + $0xc] sm:$0xff]   ;;  %v2389_v19 = vcombine.low %v635_v10, %v636_v12  ;;  %v2397_v27 = vld [vmem:[%s2364_s28 + $0x14] sm:$0xff]   ;;  %v2403_v33 = vld [vmem:[%s2364_s28 + $0x20] sm:$0xff]  }
  0x14   : > { %v250_v13 = vshrl.u32 %v2371_v8, 16  ;;  %v252_v14 = vshll.u32 %v2371_v8, 16  ;;  %v2387_v18 = vld [vmem:[%s2364_s28 + $0x10] sm:$0xff]   ;;  %v259_v21 = vrot.slane %v257_v15, 1  ;;  %v827_v22 = vshrl.u32 %v2384_v17, 16  ;;  %v2400_v32 = vld [vmem:[%s2364_s28 + $0x18] sm:$0xff]  }
  0x15   : > { %v830_v23 = vshll.u32 %v2384_v17, 16  ;;  %v819_v24 = vshrl.u32 %v2389_v19, 16  ;;  %v822_v25 = vshll.u32 %v2389_v19, 16  ;;  %v265_v26 = vshll.u32 %v2387_v18, 16  ;;  %v994_v43 = vld [vmem:[%s2364_s28 + $0x4] sm:$0x8] }
  0x16   : > { %v254_v20 = vrot.slane %v252_v14, 1  ;;  %v263_v29 = vor.u32 %v261_v16, %v259_v21  ;;  %v829_v30 = vrot.slane %v827_v22, 2  ;;  %v836_v37 = vshrl.u32 %v2397_v27, 16  ;;  %v2422_v52 = vld [vmem:[%s2364_s28 + $0x28] sm:$0xff]   ;;  %v2454_v16 = vld [vmem:[%s2364_s28 + $0x1c] sm:$0xff]  }
  0x17   : > { %v832_v31 = vrot.slane %v830_v23, 3  ;;  %v821_v34 = vrot.slane %v819_v24, 2  ;;  %v824_v35 = vrot.slane %v822_v25, 3  ;;  %v267_v36 = vrot.slane %v265_v26, 1  ;;  %v2461_v24 = vld [vmem:[%s2364_s28 + $0x24] sm:$0xff]   ;;  %v2465_v26 = vld [vmem:[%s2364_s28 + $0x2c] sm:$0xff]  }
  0x18   : > { %v255_v28 = vor.u32 %v254_v20, %v250_v13  ;;  %v839_v41 = vshll.u32 %v2397_v27, 16  ;;  %v269_v42 = vshrl.u32 %v2387_v18, 16  ;;  %v838_v46 = vrot.slane %v836_v37, 2  ;;  %v2427_v57 = vld [vmem:[%s2364_s28 + $0x30] ss:$0 sps:$4 sm:$0x11]  }
  0x19   : > { %v833_v40 = vor.u32 %v832_v31, %v829_v30  ;;  %v825_v44 = vor.u32 %v824_v35, %v821_v34  ;;  %v268_v45 = vsel %vm248_vm1, %v263_v29, %v267_v36  ;;  %v273_v47 = vshll.u32 %v2400_v32, 16  ;;  %v2471_v29 = vld [vmem:[%s2771_s1 + $0xe] sm:$0x3]  ;;  %v2474_v30 = vld [vmem:[%s2364_s28 + $0x14] sm:$0xff]   ;;  %v2479_v35 = vld [vmem:[%s2364_s28 + $0x1c] sm:$0xff]  }
  0x1a   : > { %v260_v39 = vsel %vm248_vm1, %v255_v28, %v259_v21  ;;  %v841_v48 = vrot.slane %v839_v41, 3  ;;  %v271_v49 = vor.u32 %v269_v42, %v267_v36  ;;  %v277_v50 = vshrl.u32 %v2400_v32, 16 }
  0x1b   : > { %2016 = vmatprep.mubr.msk.bf16.mxu1 %vm301_vm2, %v260_v39  ;;  %v281_v51 = vshll.u32 %v2403_v33, 16  ;;  %v834_v53 = vsel %vm817_vm3, %v825_v44, %v833_v40  ;;  %v275_v54 = vrot.slane %v273_v47, 1  ;;  %v1881_v55 = vcombine.low %v994_v43, %v636_v12  ;;  %v2485_v39 = vld [vmem:[%s2364_s28 + $0x24] sm:$0xff]   ;;  %v2495_v43 = vld [vmem:[%s2364_s28 + $0x2c] sm:$0xff]  }
  0x1c   : > { %2017 = vmatmul.mubr.msk.bf16.vlgmr.msra.gmra.mrb[0].mxu1 %vm301_vm2, %v268_v45  ;;  %v1002_v56 = vrot.slane %v2384_v17, 3  ;;  %2072 = vmatprep.mubr.msk.bf16.mxu0 %vm301_vm2, %v834_v53  ;;  %v2430_v58 = vor.u32 %v841_v48, %v838_v46  ;;  %v285_v61 = vshrl.u32 %v2403_v33, 16  ;;  %v289_v4 = vshll.u32 %v2422_v52, 16 }
  0x1d   : > { %2029 = vmatpush3.bf16.msra.mxu1 %v418_v11  ;;  %v283_v60 = vrot.slane %v281_v51, 1  ;;  %v276_v63 = vsel %vm248_vm1, %v271_v49, %v275_v54  ;;  %v279_v0 = vor.u32 %v277_v50, %v275_v54  ;;  %v1001_v2 = vrot.slane %v1881_v55, 3  ;;  %v2508_v49 = vld [vmem:[%s2364_s28 + $0x34] sm:$0xff]  }
  0x1e   : > { %2240 = vmatprep.subr.msk.bf16.mxu1 %vm320_vm0, %v2409_v38  ;;  %v843_v5 = vsel %vm817_vm3, %v833_v40, %v2430_v58  ;;  %2020 = vmatprep.mubr.msk.bf16.mxu1 %vm301_vm2, %v276_v63  ;;  %v293_v10 = vshrl.u32 %v2422_v52, 16  ;;  %v291_v13 = vrot.slane %v289_v4, 1  ;;  %v297_v14 = vshll.u32 %v2427_v57, 16  ;;  %v2512_v51 = vld [vmem:[%s2364_s28 + $0x34] ss:$0 sps:$4 sm:$0x77]  }
  0x1f   : > { %v287_v6 = vor.u32 %v285_v61, %v283_v60  ;;  %2073 = vmatmul.mubr.msk.bf16.vlgmr.msra.gmra.mrb[0].mxu0 %vm301_vm2, %v843_v5  ;;  %v284_v11 = vsel %vm248_vm1, %v279_v0, %v283_v60  ;;  %v1003_v12 = vsel %vm1000_vm4, %v1001_v2, %v1002_v56  ;;  %v1004_v22 = vrot.slane %v2397_v27, 3  ;;  %v2286_v4 = vld [vmem:[%s2364_s28 + $0x3c] ss:$0 sps:$4 sm:$0x11]  }
  0x20   : > { %2085 = vmatpush3.bf16.msra.mxu0 %v1033_v59  ;;  %2086 = vmatprep.mubr.msk.bf16.mxu0 %vm301_vm2, %v1003_v12  ;;  %v295_v20 = vor.u32 %v293_v10, %v291_v13  ;;  %v299_v21 = vrot.slane %v297_v14, 1  ;;  %v1006_v23 = vrot.slane %v2454_v16, 3  ;;  %v1191_v31 = vsel %vm320_vm0, %v1888_v62, 0  ;;  %v2541_v10 = vld [vmem:[%s2771_s1 + $0x6] sm:$0x3] }
  0x21   : > { %v292_v15 = vsel %vm248_vm1, %v287_v6, %v291_v13  ;;  %2245 = vmatprep.subr.msk.bf16.mxu0 %vm320_vm0, %v1888_v62  ;;  %v1005_v28 = vsel %vm1000_vm4, %v1002_v56, %v1004_v22  ;;  %v1008_v36 = vrot.slane %v2461_v24, 3  ;;  %v1342_v37 = vshll.u32 %v2474_v30, 16 }
  0x22   : > { %v300_v25 = vsel %vm248_vm1, %v295_v20, %v299_v21  ;;  %v1007_v34 = vsel %vm1000_vm4, %v1004_v22, %v1006_v23  ;;  %v540_v40 = vsel %vm320_vm0, %v2409_v38, 0  ;;  %v1346_v41 = vshrl.u32 %v2474_v30, 16  ;;  %v501_v22 = vld [vmem:[%s2364_s28] sm:$0xe] }
  0x23   : > { %v1350_v42 = vshll.u32 %v2479_v35, 16  ;;  %v1010_v44 = vrot.slane %v2465_v26, 3  ;;  %v2499_v45 = vrot.slane %v1342_v37, 1  ;;  %v1354_v46 = vshrl.u32 %v2479_v35, 16 }
  0x24   : > { %2021 = vmatmul.mubr.msk.bf16.gmra.mrb[4].mxu1 %vm301_vm2, %v284_v11  ;;  %v1362_v47 = vshrl.u32 %v2485_v39, 16  ;;  %v1366_v48 = vshll.u32 %v2495_v43, 16  ;;  %v1009_v50 = vsel %vm1000_vm4, %v1006_v23, %v1008_v36  ;;  %v684_v55 = vrot.slane %v2389_v19, 2 }
  0x25   : > { %2024 = vmatprep.mubr.msk.bf16.mxu1 %vm301_vm2, %v292_v15  ;;  %v1352_v38 = vrot.slane %v1350_v42, 1  ;;  %v1348_v53 = vor.u32 %v1346_v41, %v2499_v45  ;;  %v685_v60 = vrot.slane %v2384_v17, 2  ;;  %v687_v61 = vrot.slane %v2397_v27, 2 }
  0x26   : > { %v1368_v59 = vrot.slane %v1366_v48, 1  ;;  %v1011_v62 = vsel %vm1000_vm4, %v1008_v36, %v1010_v44  ;;  %v1370_v2 = vshrl.u32 %v2495_v43, 16  ;;  %v1374_v6 = vshll.u32 %v2508_v49, 16  ;;  %v2273_v36 = vld [vmem:[%s2364_s28 + $0xc] sm:$0xff]  }
  0x27   : > { %v1356_v56 = vor.u32 %v1354_v46, %v1352_v38  ;;  %v2520_v63 = vsel %vm248_vm1, %v1348_v53, %v1352_v38  ;;  %v2528_v19 = vsel %vm683_vm5, %v684_v55, %v685_v60  ;;  %v2533_v17 = vsel %vm683_vm5, %v685_v60, %v687_v61 }
  0x28   : > { %v1372_v12 = vor.u32 %v1370_v2, %v1368_v59  ;;  %v1378_v13 = vshrl.u32 %v2508_v49, 16  ;;  %v1382_v14 = vshll.u32 %v2286_v4, 16  ;;  %v1376_v15 = vrot.slane %v1374_v6, 1  ;;  %v2587_v6 = vld [vmem:[%s2364_s28 + $0x10] sm:$0xf] }
  0x29   : > { %v1012_v20 = vrot.slane %v2512_v51, 3  ;;  %v1851_v37 = vcombine.low %v501_v22, %v2368_v7  ;;  %v854_v41 = vshrl.u32 %v2461_v24, 16  ;;  %v509_v42 = vrot.slane %v2374_v9, 1 }
  0x2a   : > { %v1384_v21 = vrot.slane %v1382_v14, 1  ;;  %v2556_v23 = vsel %vm248_vm1, %v1372_v12, %v1376_v15  ;;  %v1517_v48 = vrot.slane %v2286_v4, 1  ;;  %v872_v53 = vshrl.u32 %v2512_v51, 16  ;;  %v1286_v4 = vld [vmem:[%s2364_s28 + $0xc] sm:$0xf]  ;;  %v2274_v14 = vld [vmem:[%s2364_s28 + $0x14] sm:$0xff]  }
  0x2b   : > { %2087 = vmatmul.mubr.msk.bf16.vlgmr.msra.gmra.mrb[0].mxu0 %vm301_vm2, %v1005_v28  ;;  %v693_v27 = vrot.slane %v2465_v26, 2 }
  0x2c   : > { %2025 = vmatmul.mubr.msk.bf16.gmra.mrb[8].mxu1 %vm301_vm2, %v300_v25  ;;  %2099 = vmatpush3.bf16.msra.mxu0 %v1191_v31  ;;  %v1380_v25 = vor.u32 %v1378_v13, %v1376_v15  ;;  %v845_v31 = vshrl.u32 %v2454_v16, 16  ;;  %v874_v2 = vrot.slane %v872_v53, 2 }
  0x2d   : > { %2030 = vmatprep.mubr.msk.bf16.mxu1 %vm301_vm2, %v2371_v8  ;;  %2090 = vmatprep.mubr.msk.bf16.mxu0 %vm301_vm2, %v1007_v34  ;;  %v1358_v8 = vshll.u32 %v2485_v39, 16  ;;  %v1013_v34 = vsel %vm1000_vm4, %v1010_v44, %v1012_v20  ;;  %v1515_v44 = vrot.slane %v2508_v49, 1 }
  0x2e   : > { %2246 = vmatprep.subr.msk.bf16.mxu0 %vm320_vm0, %v2471_v29  ;;  %v2559_v28 = vsel %vm248_vm1, %v1380_v25, %v1384_v21  ;;  %v847_v46 = vrot.slane %v845_v31, 2  ;;  %v2275_v21 = vld [vmem:[%s2364_s28 + $0x1c] sm:$0xff]   ;;  %v1405_v25 = vsel %vm320_vm0, %v2471_v29, 0  ;;  %v1902_v31 = vcombine.low %v1286_v4, %v2587_v6 }
  0x2f   : > { %v1360_v54 = vrot.slane %v1358_v8, 1  ;;  %v857_v8 = vshll.u32 %v2461_v24, 16  ;;  %v511_v29 = vrot.slane %v2387_v18, 1 }
  0x31   : > { %v1364_v0 = vor.u32 %v1362_v47, %v1360_v54  ;;  %v2525_v5 = vsel %vm248_vm1, %v1356_v56, %v1360_v54  ;;  %v856_v47 = vrot.slane %v854_v41, 2  ;;  %v859_v7 = vrot.slane %v857_v8, 3  ;;  %v2276_v41 = vld [vmem:[%s2364_s28 + $0x24] sm:$0xff]  }
  0x32   : > { %v508_v54 = vrot.slane %v1851_v37, 1  ;;  %v2582_v56 = vsel %vm507_vm6, %v1515_v44, %v1517_v48  ;;  %v513_v37 = vrot.slane %v2400_v32, 1  ;;  %v716_v8 = vsel %vm320_vm0, %v2541_v10, 0 }
  0x33   : > { %v2544_v11 = vsel %vm248_vm1, %v1364_v0, %v1368_v59  ;;  %2091 = vmatmul.mubr.msk.bf16.gmra.mrb[4].mxu0 %vm301_vm2, %v1009_v50  ;;  %v866_v50 = vshll.u32 %v2465_v26, 16  ;;  %v875_v59 = vshll.u32 %v2512_v51, 16  ;;  %v860_v60 = vor.u32 %v859_v7, %v856_v47 }
  0x34   : > { %2031 = vmatmul.mubr.msk.bf16.vlgmr.msra.gmra.mrb[0].mxu1 %vm301_vm2, %v2374_v9  ;;  %2094 = vmatprep.mubr.msk.bf16.mxu0 %vm301_vm2, %v1011_v62  ;;  %v863_v9 = vshrl.u32 %v2465_v26, 16  ;;  %v510_v51 = vsel %vm507_vm6, %v508_v54, %v509_v42  ;;  %v514_v47 = vsel %vm507_vm6, %v511_v29, %v513_v37  ;;  %v1335_v48 = vshrl.u32 %v1902_v31, 16 }
  0x35   : > { %2043 = vmatpush3.bf16.msra.mxu1 %v540_v40  ;;  %2034 = vmatprep.mubr.msk.bf16.mxu1 %vm301_vm2, %v2387_v18  ;;  %v848_v40 = vshll.u32 %v2454_v16, 16  ;;  %v868_v0 = vrot.slane %v866_v50, 3  ;;  %v877_v13 = vrot.slane %v875_v59, 3  ;;  %v1511_v26 = vrot.slane %v2485_v39, 1 }
  0x36   : > { %2241 = vmatprep.subr.msk.bf16.mxu1 %vm320_vm0, %v2541_v10  ;;  %v865_v62 = vrot.slane %v863_v9, 2  ;;  %v2279_v10 = vld [vmem:[%s2364_s28 + $0x34] sm:$0xff]  }
  0x37   : > { %v850_v38 = vrot.slane %v848_v40, 3  ;;  %v878_v22 = vor.u32 %v877_v13, %v874_v2  ;;  %v1337_v40 = vshll.u32 %v1902_v31, 16 }
  0x38   : > { %v869_v20 = vor.u32 %v868_v0, %v865_v62  ;;  %v2706_v0 = vld [vmem:[%s2772_s2] ss:$0 sm:$0xff] }
  0x39   : > { %v851_v55 = vor.u32 %v850_v38, %v847_v46  ;;  %v512_v46 = vsel %vm507_vm6, %v509_v42, %v511_v29  ;;  %v2278_v38 = vld [vmem:[%s2364_s28 + $0x2c] sm:$0xff]   ;;  %v1339_v18 = vrot.slane %v1337_v40, 1  ;;  %v517_v42 = vrot.slane %v2422_v52, 1 }
  0x3b   : > { %2095 = vmatmul.mubr.msk.bf16.gmra.mrb[8].mxu0 %vm301_vm2, %v1013_v34  ;;  %v2591_v12 = vsel %vm817_vm3, %v2430_v58, %v851_v55  ;;  %v2595_v15 = vsel %vm817_vm3, %v851_v55, %v860_v60  ;;  %v2603_v58 = vsel %vm817_vm3, %v860_v60, %v869_v20  ;;  %v1915_v34 = vld [vmem:[%s2771_s1 + $0x10] sm:$0x3]  ;;  %v1340_v7 = vor.u32 %v1339_v18, %v1335_v48 }
  0x3c   : > { %2035 = vmatmul.mubr.msk.bf16.gmra.mrb[4].mxu1 %vm301_vm2, %v2400_v32  ;;  %2100 = vmatprep.mubr.msk.bf16.mxu0 %vm301_vm2, %v2273_v36  ;;  %v2611_v36 = vsel %vm817_vm3, %v869_v20, %v878_v22  ;;  %v515_v32 = vrot.slane %v2403_v33, 1 }
  0x3d   : > { %2038 = vmatprep.mubr.msk.bf16.mxu1 %vm301_vm2, %v2403_v33  ;;  %v1345_v53 = vsel %vm248_vm1, %v1340_v7, %v2499_v45  ;;  %v519_v33 = vrot.slane %v2427_v57, 1  ;;  %v689_v57 = vrot.slane %v2454_v16, 2  ;;  %v1500_v45 = vld [vmem:[%s2364_s28 + $0xc] sm:$0xe] }
  0x3e   : > { %v516_v9 = vsel %vm507_vm6, %v513_v37, %v515_v32  ;;  %v518_v50 = vsel %vm507_vm6, %v515_v32, %v517_v42  ;;  %v1916_v55 = vcombine.low %v1500_v45, %v2587_v6  ;;  %v2711_v6 = vld [vmem:[%s2773_s3] ss:$0 sm:$0xff] }
  0x3f   : > { %v690_v54 = vsel %vm683_vm5, %v687_v61, %v689_v57  ;;  %v1507_v61 = vrot.slane %v2474_v30, 1 }
  0x40   : > { %v1506_v16 = vrot.slane %v1916_v55, 1 }
  0x43   : > { %2101 = vmatmul.mubr.msk.bf16.vlgmr.msra.gmra.mrb[0].mxu0 %vm301_vm2, %v2274_v14 }
  0x44   : > { %2039 = vmatmul.mubr.msk.bf16.gmra.mrb[8].mxu1 %vm301_vm2, %v2422_v52  ;;  %2113 = vmatpush3.bf16.msra.mxu0 %v1405_v25  ;;  %v1538_v52 = vsel %vm320_vm0, %v1915_v34, 0 }
  0x45   : > { %2044 = vmatprep.mubr.msk.bf16.mxu1 %vm301_vm2, %v510_v51  ;;  %2104 = vmatprep.mubr.msk.bf16.mxu0 %vm301_vm2, %v2275_v21 }
  0x46   : > { %2247 = vmatprep.subr.msk.bf16.mxu0 %vm320_vm0, %v1915_v34 }
  0x4b   : > { %2105 = vmatmul.mubr.msk.bf16.gmra.mrb[4].mxu0 %vm301_vm2, %v2276_v41 }
  0x4c   : > { %2045 = vmatmul.mubr.msk.bf16.vlgmr.msra.gmra.mrb[0].mxu1 %vm301_vm2, %v512_v46  ;;  %2108 = vmatprep.mubr.msk.bf16.mxu0 %vm301_vm2, %v2278_v38 }
  0x4d   : > { %2057 = vmatpush3.bf16.msra.mxu1 %v716_v8  ;;  %2048 = vmatprep.mubr.msk.bf16.mxu1 %vm301_vm2, %v514_v47 }
  0x4e   : > { %2243 = vmatprep.subr.msk.bf16.mxu1 %vm320_vm0, %v2336_v1  ;;  %v520_v1 = vsel %vm507_vm6, %v517_v42, %v519_v33 }
  0x53   : > { %2109 = vmatmul.mubr.msk.bf16.gmra.mrb[8].mxu0 %vm301_vm2, %v2279_v10 }
  0x54   : > { %2049 = vmatmul.mubr.msk.bf16.gmra.mrb[4].mxu1 %vm301_vm2, %v516_v9  ;;  %2114 = vmatprep.mubr.msk.bf16.mxu0 %vm301_vm2, %v1345_v53 }
  0x55   : > { %2052 = vmatprep.mubr.msk.bf16.mxu1 %vm301_vm2, %v518_v50 }
  0x5b   : > { %2115 = vmatmul.mubr.msk.bf16.vlgmr.msra.gmra.mrb[0].mxu0 %vm301_vm2, %v2520_v63  ;;  %v691_v63 = vrot.slane %v2461_v24, 2  ;;  %v1509_v24 = vrot.slane %v2479_v35, 1 }
  0x5c   : > { %2053 = vmatmul.mubr.msk.bf16.gmra.mrb[8].mxu1 %vm301_vm2, %v520_v1  ;;  %2127 = vmatpush3.bf16.msra.mxu0 %v1538_v52 }
  0x5d   : > { %2058 = vmatprep.mubr.msk.bf16.mxu1 %vm301_vm2, %v2528_v19  ;;  %2118 = vmatprep.mubr.msk.bf16.mxu0 %vm301_vm2, %v2525_v5  ;;  %v692_v5 = vsel %vm683_vm5, %v689_v57, %v691_v63  ;;  %v2288_v19 = vld [vmem:[%s2364_s28 + $0x34] ss:$0 sps:$4 sm:$0x33]   ;;  %v1512_v59 = vsel %vm507_vm6, %v1509_v24, %v1511_v26 }
  0x63   : > { %2119 = vmatmul.mubr.msk.bf16.gmra.mrb[4].mxu0 %vm301_vm2, %v2544_v11  ;;  %v1508_v11 = vsel %vm507_vm6, %v1506_v16, %v1507_v61 }
  0x64   : > { %2059 = vmatmul.mubr.msk.bf16.vlgmr.msra.gmra.mrb[0].mxu1 %vm301_vm2, %v2533_v17  ;;  %2122 = vmatprep.mubr.msk.bf16.mxu0 %vm301_vm2, %v2556_v23  ;;  %v694_v17 = vsel %vm683_vm5, %v691_v63, %v693_v27  ;;  %v1510_v23 = vsel %vm507_vm6, %v1507_v61, %v1509_v24 }
  0x65   : > { %2141 = vmatpush3.bf16.msra.mxu1 %v2344_v3  ;;  %2062 = vmatprep.mubr.msk.bf16.mxu1 %vm301_vm2, %v690_v54  ;;  %v695_v3 = vrot.slane %v2288_v19, 2 }
  0x67   : > { %v696_v30 = vsel %vm683_vm5, %v693_v27, %v695_v3 }
  0x6b   : > { %2123 = vmatmul.mubr.msk.bf16.gmra.mrb[8].mxu0 %vm301_vm2, %v2559_v28  ;;  %v1513_v28 = vrot.slane %v2495_v43, 1 }
  0x6c   : > { %2063 = vmatmul.mubr.msk.bf16.gmra.mrb[4].mxu1 %vm301_vm2, %v692_v5  ;;  %2128 = vmatprep.mubr.msk.bf16.mxu0 %vm301_vm2, %v1508_v11 }
  0x6d   : > { %2066 = vmatprep.mubr.msk.bf16.mxu1 %vm301_vm2, %v694_v17  ;;  %v1514_v35 = vsel %vm507_vm6, %v1511_v26, %v1513_v28  ;;  %v1516_v39 = vsel %vm507_vm6, %v1513_v28, %v1515_v44 }
  0x73   : > { %2129 = vmatmul.mubr.msk.bf16.vlgmr.msra.gmra.mrb[0].mxu0 %vm301_vm2, %v1510_v23 }
  0x74   : > { %2067 = vmatmul.mubr.msk.bf16.gmra.mrb[8].mxu1 %vm301_vm2, %v696_v30  ;;  %2132 = vmatprep.mubr.msk.bf16.mxu0 %vm301_vm2, %v1512_v59 }
  0x75   : > { %2076 = vmatprep.mubr.msk.bf16.mxu1 %vm301_vm2, %v2591_v12 }
  0x7b   : > { %2133 = vmatmul.mubr.msk.bf16.gmra.mrb[4].mxu0 %vm301_vm2, %v1514_v35 }
  0x7c   : > { %2077 = vmatmul.mubr.msk.bf16.vlgmr.msra.gmra.mrb[4].mxu1 %vm301_vm2, %v2595_v15  ;;  %2136 = vmatprep.mubr.msk.bf16.mxu0 %vm301_vm2, %v1516_v39 }
  0x7d   : > { %2080 = vmatprep.mubr.msk.bf16.mxu1 %vm301_vm2, %v2603_v58 }
  0x83   : > { %2137 = vmatmul.mubr.msk.bf16.gmra.mrb[8].mxu0 %vm301_vm2, %v2582_v56 }
  0x84   : > { %2081 = vmatmul.mubr.msk.bf16.gmra.mrb[8].mxu1 %vm301_vm2, %v2611_v36 }
 0x137   : > { %v2060_v43 = vpop.f32.mrb[0].mxu1 }
 0x138   : > { %v752_v49 = vpop.f32.mrb[1].mxu1 }
 0x139   : > { %v2061_v44 = vpop.f32.mrb[2].mxu1 }
 0x13a   : > { %v755_v60 = vpop.f32.mrb[3].mxu1 }
 0x146   : > { %v2130_v62 = vpop.f32.mrb[0].mxu0 }
 0x147   : > { %v2142_v2 = vadd.f32 %v2130_v62, %v2060_v43  ;;  %v1574_v4 = vpop.f32.mrb[1].mxu0 }
 0x148   : > { %v2143_v12 = vadd.f32 %v1574_v4, %v752_v49  ;;  %v2131_v56 = vpop.f32.mrb[2].mxu0 }
 0x149   : > { %v1642_v13 = vmul.f32 %v2142_v2, %v2706_v0  ;;  %v2144_v14 = vadd.f32 %v2131_v56, %v2061_v44  ;;  %v1577_v15 = vpop.f32.mrb[3].mxu0 }
 0x14a   : > { %v1640_v20 = vmul.f32 %v2143_v12, %v2706_v0  ;;  %v2145_v21 = vadd.f32 %v1577_v15, %v755_v60 }
 0x14b   : > { %v1661_v51 = vadd.f32 %v2711_v6, %v1642_v13  ;;  %v1643_v22 = vmul.f32 %v2144_v14, %v2706_v0 }
 0x14c   : > { %v1659_v25 = vadd.f32 %v2711_v6, %v1640_v20  ;;  %v1641_v31 = vmul.f32 %v2145_v21, %v2706_v0 }
 0x14d   : > { %vm1673_vm7 = vcmp.ge.f32.partialorder %v1661_v51, 0.0  ;;  %v1685_v58 = vmul.f32 0.01, %v1661_v51  ;;  %v1662_v34 = vadd.f32 %v2711_v6, %v1643_v22 }
 0x14e   : > { %vm1671_vm9 = vcmp.ge.f32.partialorder %v1659_v25, 0.0  ;;  %v1683_v29 = vmul.f32 0.01, %v1659_v25  ;;  %v1660_v37 = vadd.f32 %v2711_v6, %v1641_v31  ;;  %v2134_v40 = vpop.f32.mrb[4].mxu0 }
 0x14f   : > { %v2078_v36 = vpop.f32.mrb[4].mxu1  ;;  %v1697_v46 = vsel %vm1673_vm7, %v1661_v51, %v1685_v58  ;;  %vm1674_vm10 = vcmp.ge.f32.partialorder %v1662_v34, 0.0  ;;  %v1686_v8 = vmul.f32 0.01, %v1662_v34  ;;  %v1590_v38 = vpop.f32.mrb[5].mxu0 }
 0x150   : > { %v951_v41 = vpop.f32.mrb[5].mxu1  ;;  %v2146_v47 = vadd.f32 %v2134_v40, %v2078_v36  ;;  %v1941_v18 = vpack.c.bf16 %v1697_v46, %v1697_v46  ;;  %v1695_v32 = vsel %vm1671_vm9, %v1659_v25, %v1683_v29  ;;  %vm1672_vm11 = vcmp.ge.f32.partialorder %v1660_v37, 0.0  ;;  %v2135_v7 = vpop.f32.mrb[6].mxu0 }
 0x151   : > { %v2079_v48 = vpop.f32.mrb[6].mxu1  ;;  %v1684_v42 = vmul.f32 0.01, %v1660_v37  ;;  %v1939_v9 = vpack.c.bf16 %v1695_v32, %v1695_v32  ;;  %v1698_v50 = vsel %vm1674_vm10, %v1662_v34, %v1686_v8  ;;  %v1593_v53 = vpop.f32.mrb[7].mxu0  ;;  %v2147_v1 = vadd.f32 %v1590_v38, %v951_v41 }
 0x152   : > { %v954_v10 = vpop.f32.mrb[7].mxu1  ;;  %v1646_v33 = vmul.f32 %v2146_v47, %v2706_v0  ;;  %1758 = vst.msk [vmem:[%s2725_s21 + $0x8] sm:$0xf] %vm1755_vm8, %v1941_v18  ;;  %v1942_v52 = vpack.c.bf16 %v1698_v50, %v1698_v50  ;;  %v2148_v45 = vadd.f32 %v2135_v7, %v2079_v48 }
 0x153   : > { %v1696_v57 = vsel %vm1672_vm11, %v1660_v37, %v1684_v42  ;;  %v2149_v54 = vadd.f32 %v1593_v53, %v954_v10  ;;  %1756 = vst.msk [vmem:[%s2725_s21] sm:$0xf] %vm1755_vm8, %v1939_v9  ;;  %v1644_v27 = vmul.f32 %v2147_v1, %v2706_v0 }
 0x154   : > { %v1940_v55 = vpack.c.bf16 %v1696_v57, %v1696_v57  ;;  %v1665_v63 = vadd.f32 %v2711_v6, %v1646_v33  ;;  %1759 = vst.msk [vmem:[%s2725_s21 + $0xc] sm:$0xf] %vm1755_vm8, %v1942_v52  ;;  %v1647_v16 = vmul.f32 %v2148_v45, %v2706_v0 }
 0x155   : > { %v1645_v61 = vmul.f32 %v2149_v54, %v2706_v0  ;;  %v1663_v19 = vadd.f32 %v2711_v6, %v1644_v27 }
 0x156   : > { %1757 = vst.msk [vmem:[%s2725_s21 + $0x4] sm:$0xf] %vm1755_vm8, %v1940_v55  ;;  %vm1677_vm12 = vcmp.ge.f32.partialorder %v1665_v63, 0.0  ;;  %v1689_v5 = vmul.f32 0.01, %v1665_v63  ;;  %v1666_v11 = vadd.f32 %v2711_v6, %v1647_v16  ;;  %v2138_v24 = vpop.f32.mrb[8].mxu0 }
 0x157   : > { %v2082_v17 = vpop.f32.mrb[8].mxu1  ;;  %v1664_v3 = vadd.f32 %v2711_v6, %v1645_v61  ;;  %vm1675_vm13 = vcmp.ge.f32.partialorder %v1663_v19, 0.0  ;;  %v1687_v23 = vmul.f32 0.01, %v1663_v19  ;;  %v1606_v59 = vpop.f32.mrb[9].mxu0 }
 0x158   : > { %v967_v26 = vpop.f32.mrb[9].mxu1  ;;  %v1701_v30 = vsel %vm1677_vm12, %v1665_v63, %v1689_v5  ;;  %v2150_v28 = vadd.f32 %v2138_v24, %v2082_v17  ;;  %vm1678_vm14 = vcmp.ge.f32.partialorder %v1666_v11, 0.0  ;;  %v1690_v43 = vmul.f32 0.01, %v1666_v11  ;;  %v2139_v49 = vpop.f32.mrb[10].mxu0 }
 0x159   : > { %v2083_v35 = vpop.f32.mrb[10].mxu1  ;;  %v1945_v39 = vpack.c.bf16 %v1701_v30, %v1701_v30  ;;  %vm1676_vm15 = vcmp.ge.f32.partialorder %v1664_v3, 0.0  ;;  %v1699_v60 = vsel %vm1675_vm13, %v1663_v19, %v1687_v23  ;;  %v1688_v62 = vmul.f32 0.01, %v1664_v3  ;;  %v1609_v2 = vpop.f32.mrb[11].mxu0 }
 0x15a   : > { %v970_v44 = vpop.f32.mrb[11].mxu1  ;;  %v1650_v4 = vmul.f32 %v2150_v28, %v2706_v0  ;;  %v2151_v12 = vadd.f32 %v1606_v59, %v967_v26  ;;  %v1943_v56 = vpack.c.bf16 %v1699_v60, %v1699_v60  ;;  %v1702_v13 = vsel %vm1678_vm14, %v1666_v11, %v1690_v43 }
 0x15b   : > { %1762 = vst.msk [vmem:[%s2725_s21 + $0x18] sm:$0xf] %vm1755_vm8, %v1945_v39  ;;  %v2152_v14 = vadd.f32 %v2139_v49, %v2083_v35  ;;  %v2153_v15 = vadd.f32 %v1609_v2, %v970_v44  ;;  %v1946_v20 = vpack.c.bf16 %v1702_v13, %v1702_v13  ;;  %v1700_v21 = vsel %vm1676_vm15, %v1664_v3, %v1688_v62 }
 0x15c   : > { %v1669_v51 = vadd.f32 %v2711_v6, %v1650_v4  ;;  %v1648_v22 = vmul.f32 %v2151_v12, %v2706_v0  ;;  %1760 = vst.msk [vmem:[%s2725_s21 + $0x10] sm:$0xf] %vm1755_vm8, %v1943_v56  ;;  %v1944_v25 = vpack.c.bf16 %v1700_v21, %v1700_v21 }
 0x15d   : > { %v1651_v31 = vmul.f32 %v2152_v14, %v2706_v0  ;;  %v1649_v58 = vmul.f32 %v2153_v15, %v2706_v0  ;;  %1763 = vst.msk [vmem:[%s2725_s21 + $0x1c] sm:$0xf] %vm1755_vm8, %v1946_v20 }
 0x15e   : > { %vm1681_vm0 = vcmp.ge.f32.partialorder %v1669_v51, 0.0  ;;  %v1693_v34 = vmul.f32 0.01, %v1669_v51  ;;  %v1667_v36 = vadd.f32 %v2711_v6, %v1648_v22  ;;  %1761 = vst.msk [vmem:[%s2725_s21 + $0x14] sm:$0xf] %vm1755_vm8, %v1944_v25 }
 0x15f   : > { %v1670_v29 = vadd.f32 %v2711_v6, %v1651_v31  ;;  %v1668_v37 = vadd.f32 %v2711_v6, %v1649_v58 }
 0x160   : > { %v1705_v40 = vsel %vm1681_vm0, %v1669_v51, %v1693_v34  ;;  %vm1679_vm1 = vcmp.ge.f32.partialorder %v1667_v36, 0.0  ;;  %v1691_v41 = vmul.f32 0.01, %v1667_v36 }
 0x161   : > { %v1949_v0 = vpack.c.bf16 %v1705_v40, %v1705_v40  ;;  %vm1682_vm2 = vcmp.ge.f32.partialorder %v1670_v29, 0.0  ;;  %v1694_v46 = vmul.f32 0.01, %v1670_v29  ;;  %vm1680_vm3 = vcmp.ge.f32.partialorder %v1668_v37, 0.0 }
 0x162   : > { %v1703_v8 = vsel %vm1679_vm1, %v1667_v36, %v1691_v41  ;;  %v1692_v38 = vmul.f32 0.01, %v1668_v37 }
 0x163   : > { %1766 = vst.msk [vmem:[%s2725_s21 + $0x28] sm:$0xf] %vm1755_vm8, %v1949_v0  ;;  %v1947_v47 = vpack.c.bf16 %v1703_v8, %v1703_v8  ;;  %v1706_v48 = vsel %vm1682_vm2, %v1670_v29, %v1694_v46 }
 0x164   : > { %v1950_v18 = vpack.c.bf16 %v1706_v48, %v1706_v48  ;;  %v1704_v32 = vsel %vm1680_vm3, %v1668_v37, %v1692_v38 }
 0x165   : > { %1764 = vst.msk [vmem:[%s2725_s21 + $0x20] sm:$0xf] %vm1755_vm8, %v1947_v47  ;;  %v1948_v6 = vpack.c.bf16 %v1704_v32, %v1704_v32 }
 0x166   : > { %1767 = vst.msk [vmem:[%s2725_s21 + $0x2c] sm:$0xf] %vm1755_vm8, %v1950_v18 }
 0x167   : > { %1765 = vst.msk [vmem:[%s2725_s21 + $0x24] sm:$0xf] %vm1755_vm8, %v1948_v6 }
 0x168 PF: > { %s14_s15 = sadd.s32 1, %s2295_s15  }
 0x169   : > { %p11_p4 = scmp.ge.s32.totalorder %s14_s15, 4  }
 0x16b   :  { %13 = sbr.rel (!%p11_p4) target bundleno = 1 (0x1), region = 74 }

</bundles_post_ra>
